<compile_context>
chip_gen: v7x
topology: tpu7x:2x2x1
jax: 0.10.0
libtpu: 0.0.40
codegen_flags: <defaults>
</compile_context>

<pallas_src>
import functools

import jax
import jax.numpy as jnp
from jax.experimental import pallas as pl
from jax.experimental.pallas import tpu as pltpu


def _sal_token_kernel(fea_ref, gamma_ref, beta_ref, wq_ref, wk_ref, wv_ref,
                      wp_ref, bp_ref, out_ref, *, block_b, seq_n, num_heads,
                      eps, use_bf16_matmul):
    Bt = block_b
    N = seq_n
    C = fea_ref.shape[-1]
    M = Bt * N
    H = num_heads
    hd = C // H
    BH = Bt * H
    mm = jnp.bfloat16 if use_bf16_matmul else jnp.float32

    # ---- LayerNorm over channels (PyTorch semantics, eps inside rsqrt) ----
    fea3 = fea_ref[...].astype(jnp.float32)                       # (Bt, N, C)
    mean = jnp.mean(fea3, axis=-1, keepdims=True)
    var = jnp.mean(jnp.square(fea3 - mean), axis=-1, keepdims=True)
    x3 = (fea3 - mean) * jax.lax.rsqrt(var + eps)
    x3 = x3 * gamma_ref[...] + beta_ref[...]                      # gamma/beta (1, C)

    x = x3.reshape(M, C)                                          # all tokens (rows 0/N-1 discarded later)
    x0 = x3[:, 0, :]                                              # (Bt, C) saliency tokens

    # ---- saliency-token k / v projections (scale pre-folded into Wk) ----
    x0m = x0.astype(mm)
    k0 = jnp.dot(x0m, wk_ref[...].astype(mm),
                 preferred_element_type=jnp.float32)              # (Bt, C), includes scale
    v0 = jnp.dot(x0m, wv_ref[...].astype(mm),
                 preferred_element_type=jnp.float32)              # (Bt, C)

    # ---- per-batch fused weights (tiny matmuls, once per grid step) ----
    if H == 1:
        kh = k0                                                   # (BH, C) == (Bt, C)
        vh = v0
    else:
        head_mask = (
            jax.lax.broadcasted_iota(jnp.int32, (H, C), 1) // hd
            == jax.lax.broadcasted_iota(jnp.int32, (H, C), 0)
        ).astype(jnp.float32)                                     # (H, C) per-head channel mask
        kh = (k0[:, None, :] * head_mask[None, :, :]).reshape(BH, C)
        vh = (v0[:, None, :] * head_mask[None, :, :]).reshape(BH, C)

    # logits = x @ qk_w  with  qk_w = Wq^T @ kh^T          (fusion #1)
    qk_w = jnp.dot(wq_ref[...].astype(mm), kh.T.astype(mm),
                   preferred_element_type=jnp.float32)            # (C, BH)
    # y_attn = gate @ vp_w  with  vp_w = vh @ Wproj^T       (fusion #2)
    vp_w = jnp.dot(vh.astype(mm), wp_ref[...].astype(mm),
                   preferred_element_type=jnp.float32)            # (BH, C)

    # ---- single-token attention with sigmoid gate ----
    logits = jnp.dot(x.astype(mm), qk_w.astype(mm),
                     preferred_element_type=jnp.float32)          # (M, BH)
    gate = jax.nn.sigmoid(logits)
    if Bt > 1:
        # Zero gate entries that belong to another batch element of the block.
        r = jax.lax.broadcasted_iota(jnp.int32, (M, BH), 0)
        c = jax.lax.broadcasted_iota(jnp.int32, (M, BH), 1)
        gate = jnp.where((r // N) == (c // H), gate, 0.0)
    # attn_drop / proj_drop are identity (p = 0.0 / eval mode).

    y = jnp.dot(gate.astype(mm), vp_w.astype(mm),
                preferred_element_type=jnp.float32)               # (M, C)
    y = y + bp_ref[...]                                           # proj bias
    y3 = y.reshape(Bt, N, C)

    # ---- residual add, write only the N-2 patch-token rows ----
    resid = fea_ref[...].astype(jnp.float32)[:, 1:N - 1, :]
    out_ref[...] = (y3[:, 1:N - 1, :] + resid).astype(out_ref.dtype)


def _vmem_bytes_estimate(block_b, N, C, num_heads):
    """Rough per-grid-step VMEM working set (bytes)."""
    f32 = 4
    blk_in = block_b * N * C * f32
    blk_out = block_b * (N - 2) * C * f32
    weights = 4 * C * C * f32 + 3 * C * f32
    bh = max(block_b * num_heads, 128)                 # logits/gate lane-padded
    inter = 3 * block_b * N * C * f32 + 2 * block_b * N * bh * f32
    return 2 * (blk_in + blk_out + weights) + inter    # in/out/weights double-buffered


def _choose_block_b(B, N, C, num_heads, target_rows=512, budget_bytes=40 << 20):
    """Batch elements folded into the matmul M dimension per grid step."""
    # Only merge batch elements when N is a multiple of 8 so the in-kernel
    # (Bt, N, C)->(Bt*N, C) reshape is sublane-aligned (no relayout copy).
    if N % 8 != 0:
        return 1
    want = max(1, -(-target_rows // N))                # aim for >= target_rows rows
    if B >= 2:
        want = min(want, B // 2)                       # keep >= 2 grid steps (v7x: 2 TCs)
    want = max(1, min(want, B))
    while want > 1 and _vmem_bytes_estimate(want, N, C, num_heads) > budget_bytes:
        want -= 1                                      # stay inside the VMEM budget
    for bt in range(want, 0, -1):
        if B % bt == 0:
            return bt
    return 1


def saliency_token_inference_pallas(fea, params, *, num_heads=1, eps=1e-5,
                                    block_b=None, use_bf16_matmul=True):
    """fea: (B, N, C) float32.  Returns (B, N-2, C)."""
    B, N, C = fea.shape
    assert C % num_heads == 0 and N >= 3
    head_dim = C // num_heads
    scale = head_dim ** (-0.5)

    if block_b is None:
        block_b = _choose_block_b(B, N, C, num_heads)
    assert B % block_b == 0

    gamma = params["ln_gamma"].reshape(1, C).astype(jnp.float32)
    beta = params["ln_beta"].reshape(1, C).astype(jnp.float32)
    bp = params["proj_b"].reshape(1, C).astype(jnp.float32)

    # Pre-transpose PyTorch (out, in) weights to (in, out) once on the host,
    # fold the attention scale into Wk, and cast to the MXU input dtype.
    w_dtype = jnp.bfloat16 if use_bf16_matmul else jnp.float32
    wq_t = params["wq"].T.astype(w_dtype)
    wk_t = (params["wk"].T * scale).astype(w_dtype)
    wv_t = params["wv"].T.astype(w_dtype)
    wp_t = params["wproj"].T.astype(w_dtype)

    kernel = functools.partial(
        _sal_token_kernel, block_b=block_b, seq_n=N, num_heads=num_heads,
        eps=eps, use_bf16_matmul=use_bf16_matmul)

    # Explicit scoped-VMEM limit: never below 32 MiB (>= any default), never
    # above 56 MiB (headroom under v7x's 64 MiB physical VMEM).
    vmem_limit = int(min(max(2 * _vmem_bytes_estimate(block_b, N, C, num_heads),
                             32 << 20), 56 << 20))

    const2d = lambda b: (0, 0)
    out = pl.pallas_call(
        kernel,
        out_shape=jax.ShapeDtypeStruct((B, N - 2, C), fea.dtype),
        grid_spec=pltpu.PrefetchScalarGridSpec(
            num_scalar_prefetch=0,
            grid=(B // block_b,),
            in_specs=[
                pl.BlockSpec((block_b, N, C), lambda b: (b, 0, 0)),  # fea
                pl.BlockSpec((1, C), const2d),                       # ln gamma
                pl.BlockSpec((1, C), const2d),                       # ln beta
                pl.BlockSpec((C, C), const2d),                       # Wq^T
                pl.BlockSpec((C, C), const2d),                       # scale*Wk^T
                pl.BlockSpec((C, C), const2d),                       # Wv^T
                pl.BlockSpec((C, C), const2d),                       # Wproj^T
                pl.BlockSpec((1, C), const2d),                       # bproj
            ],
            out_specs=pl.BlockSpec((block_b, N - 2, C), lambda b: (b, 0, 0)),
        ),
        compiler_params=pltpu.CompilerParams(
            dimension_semantics=("parallel",),
            vmem_limit_bytes=vmem_limit),
    )(fea, gamma, beta, wq_t, wk_t, wv_t, wp_t, bp)
    return out


def _reference(fea, params, *, num_heads=1, eps=1e-5):
    """Pure-JAX reference mirroring the PyTorch forward."""
    B, N, C = fea.shape
    head_dim = C // num_heads
    scale = head_dim ** (-0.5)
    mean = jnp.mean(fea, axis=-1, keepdims=True)
    var = jnp.mean((fea - mean) ** 2, axis=-1, keepdims=True)
    x = (fea - mean) / jnp.sqrt(var + eps)
    x = x * params["ln_gamma"] + params["ln_beta"]
    t_s, f_s = x[:, 0:1, :], x[:, 1:-1, :]
    q = jnp.einsum("bnc,dc->bnd", f_s, params["wq"]).reshape(
        B, N - 2, num_heads, head_dim).transpose(0, 2, 1, 3)
    k = jnp.einsum("bnc,dc->bnd", t_s, params["wk"]).reshape(
        B, 1, num_heads, head_dim).transpose(0, 2, 1, 3)
    v = jnp.einsum("bnc,dc->bnd", t_s, params["wv"]).reshape(
        B, 1, num_heads, head_dim).transpose(0, 2, 1, 3)
    attn = jnp.einsum("bhqd,bhkd->bhqk", q, k) * scale
    attn = jax.nn.sigmoid(attn)
    infer = jnp.einsum("bhqk,bhkd->bhqd", attn, v).transpose(
        0, 2, 1, 3).reshape(B, N - 2, C)
    infer = jnp.einsum("bnc,dc->bnd", infer, params["wproj"]) + params["proj_b"]
    return infer + fea[:, 1:-1, :]


if __name__ == "__main__":
    B, N, C = 2, 18, 32       # 16 patch tokens + saliency token + contour token

    key = jax.random.PRNGKey(0)
    k_fea, k_q, k_k, k_v, k_p, k_pb = jax.random.split(key, 6)

    fea = jax.random.normal(k_fea, (B, N, C), dtype=jnp.float32)
    params = {
        "ln_gamma": jnp.ones((C,), jnp.float32),
        "ln_beta": jnp.zeros((C,), jnp.float32),
        "wq": 0.05 * jax.random.normal(k_q, (C, C), jnp.float32),
        "wk": 0.05 * jax.random.normal(k_k, (C, C), jnp.float32),
        "wv": 0.05 * jax.random.normal(k_v, (C, C), jnp.float32),
        "wproj": 0.05 * jax.random.normal(k_p, (C, C), jnp.float32),
        "proj_b": 0.01 * jax.random.normal(k_pb, (C,), jnp.float32),
    }

    # 1) f32 MXU path, num_heads = 1 (module default / RGBD_VST usage).
    out = saliency_token_inference_pallas(fea, params, num_heads=1,
                                          use_bf16_matmul=False)
    out = jax.block_until_ready(out)
    ref = _reference(fea, params, num_heads=1)
    assert out.shape == (B, N - 2, C)
    assert jnp.allclose(out, ref, atol=2e-4, rtol=2e-4), "mismatch (f32, H=1)"

    # 2) f32 MXU path, multi-head.
    out2 = saliency_token_inference_pallas(fea, params, num_heads=2,
                                           use_bf16_matmul=False)
    out2 = jax.block_until_ready(out2)
    ref2 = _reference(fea, params, num_heads=2)
    assert jnp.allclose(out2, ref2, atol=2e-4, rtol=2e-4), "mismatch (f32, H=2)"

    # 3) Default bf16 MXU path (f32 accumulation) -- looser tolerance.
    out3 = saliency_token_inference_pallas(fea, params, num_heads=2)
    out3 = jax.block_until_ready(out3)
    assert jnp.allclose(out3, ref2, atol=3e-2, rtol=3e-2), "mismatch (bf16, H=2)"

    # 4) Multi-batch fold path (block_b > 1, N divisible by 8).
    B2, N2 = 4, 24
    fea2 = jax.random.normal(jax.random.PRNGKey(1), (B2, N2, C), dtype=jnp.float32)
    out4 = saliency_token_inference_pallas(fea2, params, num_heads=1,
                                           block_b=2, use_bf16_matmul=False)
    out4 = jax.block_until_ready(out4)
    ref4 = _reference(fea2, params, num_heads=1)
    assert out4.shape == (B2, N2 - 2, C)
    assert jnp.allclose(out4, ref4, atol=2e-4, rtol=2e-4), "mismatch (f32, block_b=2)"

    print("KERNEL_OK")
</pallas_src>

<mosaic_0001>
module attributes {stable_mosaic.version = 11 : i64} {
  func.func @_sal_token_kernel(%arg0: i32, %arg1: memref<1x18x32xf32, #tpu.memory_space<vmem>>, %arg2: memref<1x32xf32, #tpu.memory_space<vmem>>, %arg3: memref<1x32xf32, #tpu.memory_space<vmem>>, %arg4: memref<32x32xf32, #tpu.memory_space<vmem>>, %arg5: memref<32x32xf32, #tpu.memory_space<vmem>>, %arg6: memref<32x32xf32, #tpu.memory_space<vmem>>, %arg7: memref<32x32xf32, #tpu.memory_space<vmem>>, %arg8: memref<1x32xf32, #tpu.memory_space<vmem>>, %arg9: memref<1x16x32xf32, #tpu.memory_space<vmem>>) attributes {dimension_semantics = [#tpu.dimension_semantics<parallel>], iteration_bounds = array<i64: 2>, scalar_prefetch = 0 : i64, scratch_operands = 0 : i64, tpu.core_type = #tpu.core_type<tc>, window_params = [{transform_indices = @transform_0, window_bounds = array<i64: 1, 18, 32>}, {pipeline_mode = #tpu.pipeline_mode<synchronous>, transform_indices = @transform_1, window_bounds = array<i64: 1, 32>}, {pipeline_mode = #tpu.pipeline_mode<synchronous>, transform_indices = @transform_2, window_bounds = array<i64: 1, 32>}, {pipeline_mode = #tpu.pipeline_mode<synchronous>, transform_indices = @transform_3, window_bounds = array<i64: 32, 32>}, {pipeline_mode = #tpu.pipeline_mode<synchronous>, transform_indices = @transform_4, window_bounds = array<i64: 32, 32>}, {pipeline_mode = #tpu.pipeline_mode<synchronous>, transform_indices = @transform_5, window_bounds = array<i64: 32, 32>}, {pipeline_mode = #tpu.pipeline_mode<synchronous>, transform_indices = @transform_6, window_bounds = array<i64: 32, 32>}, {pipeline_mode = #tpu.pipeline_mode<synchronous>, transform_indices = @transform_7, window_bounds = array<i64: 1, 32>}, {transform_indices = @transform_8, window_bounds = array<i64: 1, 16, 32>}]} {
    %c0 = arith.constant 0 : index
    %c0_0 = arith.constant 0 : index
    %c0_1 = arith.constant 0 : index
    %0 = vector.load %arg1[%c0, %c0_0, %c0_1] : memref<1x18x32xf32, #tpu.memory_space<vmem>>, vector<1x18x32xf32>
    %cst = arith.constant dense<0.000000e+00> : vector<1x18xf32>
    %1 = vector.multi_reduction <add>, %0, %cst [2] : vector<1x18x32xf32> to vector<1x18xf32>
    %2 = vector.shape_cast %1 : vector<1x18xf32> to vector<1x18x1xf32>
    %cst_2 = arith.constant 3.200000e+01 : f32
    %3 = vector.broadcast %cst_2 : f32 to vector<1x18x1xf32>
    %4 = arith.divf %2, %3 : vector<1x18x1xf32>
    %5 = vector.broadcast %4 : vector<1x18x1xf32> to vector<1x18x32xf32>
    %6 = arith.subf %0, %5 : vector<1x18x32xf32>
    %7 = arith.mulf %6, %6 : vector<1x18x32xf32>
    %cst_3 = arith.constant dense<0.000000e+00> : vector<1x18xf32>
    %8 = vector.multi_reduction <add>, %7, %cst_3 [2] : vector<1x18x32xf32> to vector<1x18xf32>
    %9 = vector.shape_cast %8 : vector<1x18xf32> to vector<1x18x1xf32>
    %cst_4 = arith.constant 3.200000e+01 : f32
    %10 = vector.broadcast %cst_4 : f32 to vector<1x18x1xf32>
    %11 = arith.divf %9, %10 : vector<1x18x1xf32>
    %12 = vector.broadcast %4 : vector<1x18x1xf32> to vector<1x18x32xf32>
    %13 = arith.subf %0, %12 : vector<1x18x32xf32>
    %cst_5 = arith.constant 9.99999974E-6 : f32
    %14 = vector.broadcast %cst_5 : f32 to vector<1x18x1xf32>
    %15 = arith.addf %11, %14 : vector<1x18x1xf32>
    %16 = math.rsqrt %15 : vector<1x18x1xf32>
    %17 = vector.broadcast %16 : vector<1x18x1xf32> to vector<1x18x32xf32>
    %18 = arith.mulf %13, %17 : vector<1x18x32xf32>
    %c0_6 = arith.constant 0 : index
    %c0_7 = arith.constant 0 : index
    %19 = vector.load %arg2[%c0_6, %c0_7] : memref<1x32xf32, #tpu.memory_space<vmem>>, vector<1x32xf32>
    %20 = vector.shape_cast %19 : vector<1x32xf32> to vector<1x1x32xf32>
    %21 = vector.broadcast %20 : vector<1x1x32xf32> to vector<1x18x32xf32>
    %22 = arith.mulf %18, %21 : vector<1x18x32xf32>
    %c0_8 = arith.constant 0 : index
    %c0_9 = arith.constant 0 : index
    %23 = vector.load %arg3[%c0_8, %c0_9] : memref<1x32xf32, #tpu.memory_space<vmem>>, vector<1x32xf32>
    %24 = vector.shape_cast %23 : vector<1x32xf32> to vector<1x1x32xf32>
    %25 = vector.broadcast %24 : vector<1x1x32xf32> to vector<1x18x32xf32>
    %26 = arith.addf %22, %25 : vector<1x18x32xf32>
    %27 = vector.shape_cast %26 : vector<1x18x32xf32> to vector<18x32xf32>
    %28 = vector.extract_strided_slice %26 {offsets = [0, 0, 0], sizes = [1, 1, 32], strides = [1, 1, 1]} : vector<1x18x32xf32> to vector<1x1x32xf32>
    %29 = vector.shape_cast %28 : vector<1x1x32xf32> to vector<1x32xf32>
    %c0_10 = arith.constant 0 : index
    %c0_11 = arith.constant 0 : index
    %30 = vector.load %arg5[%c0_10, %c0_11] : memref<32x32xf32, #tpu.memory_space<vmem>>, vector<32x32xf32>
    %cst_12 = arith.constant dense<0.000000e+00> : vector<1x32xf32>
    %31 = tpu.matmul %29, %30, %cst_12 {dimension_numbers = #tpu.dot_dimension_numbers<[1], [0], [0], [1], [0, 0, 1, 1], [], []>} : vector<1x32xf32>, vector<32x32xf32>, vector<1x32xf32> -> vector<1x32xf32>
    %c0_13 = arith.constant 0 : index
    %c0_14 = arith.constant 0 : index
    %32 = vector.load %arg6[%c0_13, %c0_14] : memref<32x32xf32, #tpu.memory_space<vmem>>, vector<32x32xf32>
    %cst_15 = arith.constant dense<0.000000e+00> : vector<1x32xf32>
    %33 = tpu.matmul %29, %32, %cst_15 {dimension_numbers = #tpu.dot_dimension_numbers<[1], [0], [0], [1], [0, 0, 1, 1], [], []>} : vector<1x32xf32>, vector<32x32xf32>, vector<1x32xf32> -> vector<1x32xf32>
    %c0_16 = arith.constant 0 : index
    %c0_17 = arith.constant 0 : index
    %34 = vector.load %arg4[%c0_16, %c0_17] : memref<32x32xf32, #tpu.memory_space<vmem>>, vector<32x32xf32>
    %35 = tpu.transpose %31, [1, 0] : vector<1x32xf32> -> vector<32x1xf32>
    %cst_18 = arith.constant dense<0.000000e+00> : vector<32x1xf32>
    %36 = tpu.matmul %34, %35, %cst_18 {dimension_numbers = #tpu.dot_dimension_numbers<[1], [0], [0], [1], [0, 0, 1, 1], [], []>} : vector<32x32xf32>, vector<32x1xf32>, vector<32x1xf32> -> vector<32x1xf32>
    %c0_19 = arith.constant 0 : index
    %c0_20 = arith.constant 0 : index
    %37 = vector.load %arg7[%c0_19, %c0_20] : memref<32x32xf32, #tpu.memory_space<vmem>>, vector<32x32xf32>
    %cst_21 = arith.constant dense<0.000000e+00> : vector<1x32xf32>
    %38 = tpu.matmul %33, %37, %cst_21 {dimension_numbers = #tpu.dot_dimension_numbers<[1], [0], [0], [1], [0, 0, 1, 1], [], []>} : vector<1x32xf32>, vector<32x32xf32>, vector<1x32xf32> -> vector<1x32xf32>
    %cst_22 = arith.constant dense<0.000000e+00> : vector<18x1xf32>
    %39 = tpu.matmul %27, %36, %cst_22 {dimension_numbers = #tpu.dot_dimension_numbers<[1], [0], [0], [1], [0, 0, 1, 1], [], []>} : vector<18x32xf32>, vector<32x1xf32>, vector<18x1xf32> -> vector<18x1xf32>
    %40 = arith.negf %39 : vector<18x1xf32>
    %41 = math.exp %40 : vector<18x1xf32>
    %cst_23 = arith.constant 1.000000e+00 : f32
    %42 = vector.broadcast %cst_23 : f32 to vector<18x1xf32>
    %43 = arith.addf %42, %41 : vector<18x1xf32>
    %44 = arith.divf %42, %43 : vector<18x1xf32>
    %cst_24 = arith.constant dense<0.000000e+00> : vector<18x32xf32>
    %45 = tpu.matmul %44, %38, %cst_24 {dimension_numbers = #tpu.dot_dimension_numbers<[1], [0], [0], [1], [0, 0, 1, 1], [], []>} : vector<18x1xf32>, vector<1x32xf32>, vector<18x32xf32> -> vector<18x32xf32>
    %c0_25 = arith.constant 0 : index
    %c0_26 = arith.constant 0 : index
    %46 = vector.load %arg8[%c0_25, %c0_26] : memref<1x32xf32, #tpu.memory_space<vmem>>, vector<1x32xf32>
    %47 = vector.broadcast %46 : vector<1x32xf32> to vector<18x32xf32>
    %48 = arith.addf %45, %47 : vector<18x32xf32>
    %49 = vector.shape_cast %48 : vector<18x32xf32> to vector<1x18x32xf32>
    %c0_27 = arith.constant 0 : index
    %c0_28 = arith.constant 0 : index
    %c0_29 = arith.constant 0 : index
    %50 = vector.load %arg1[%c0_27, %c0_28, %c0_29] : memref<1x18x32xf32, #tpu.memory_space<vmem>>, vector<1x18x32xf32>
    %51 = vector.extract_strided_slice %50 {offsets = [0, 1, 0], sizes = [1, 16, 32], strides = [1, 1, 1]} : vector<1x18x32xf32> to vector<1x16x32xf32>
    %52 = vector.extract_strided_slice %49 {offsets = [0, 1, 0], sizes = [1, 16, 32], strides = [1, 1, 1]} : vector<1x18x32xf32> to vector<1x16x32xf32>
    %53 = arith.addf %52, %51 : vector<1x16x32xf32>
    %c0_30 = arith.constant 0 : index
    %c0_31 = arith.constant 0 : index
    %c0_32 = arith.constant 0 : index
    %54 = vector.load %arg9[%c0_30, %c0_31, %c0_32] : memref<1x16x32xf32, #tpu.memory_space<vmem>>, vector<1x16x32xf32>
    tpu.vector_store %arg9[%c0_30, %c0_31, %c0_32], %53 {strides = array<i32>} : memref<1x16x32xf32, #tpu.memory_space<vmem>>, vector<1x16x32xf32>,
    return
  }
  func.func @transform_0(%arg0: i32) -> (i32, i32, i32) {
    %c0_i32 = arith.constant 0 : i32
    %c0_i32_0 = arith.constant 0 : i32
    %c0_i32_1 = arith.constant 0 : i32
    return %arg0, %c0_i32, %c0_i32_0 : i32, i32, i32
  }
  func.func @transform_1(%arg0: i32) -> (i32, i32) {
    %c0_i32 = arith.constant 0 : i32
    %c0_i32_0 = arith.constant 0 : i32
    %c0_i32_1 = arith.constant 0 : i32
    return %c0_i32, %c0_i32_0 : i32, i32
  }
  func.func @transform_2(%arg0: i32) -> (i32, i32) {
    %c0_i32 = arith.constant 0 : i32
    %c0_i32_0 = arith.constant 0 : i32
    %c0_i32_1 = arith.constant 0 : i32
    return %c0_i32, %c0_i32_0 : i32, i32
  }
  func.func @transform_3(%arg0: i32) -> (i32, i32) {
    %c0_i32 = arith.constant 0 : i32
    %c0_i32_0 = arith.constant 0 : i32
    %c0_i32_1 = arith.constant 0 : i32
    return %c0_i32, %c0_i32_0 : i32, i32
  }
  func.func @transform_4(%arg0: i32) -> (i32, i32) {
    %c0_i32 = arith.constant 0 : i32
    %c0_i32_0 = arith.constant 0 : i32
    %c0_i32_1 = arith.constant 0 : i32
    return %c0_i32, %c0_i32_0 : i32, i32
  }
  func.func @transform_5(%arg0: i32) -> (i32, i32) {
    %c0_i32 = arith.constant 0 : i32
    %c0_i32_0 = arith.constant 0 : i32
    %c0_i32_1 = arith.constant 0 : i32
    return %c0_i32, %c0_i32_0 : i32, i32
  }
  func.func @transform_6(%arg0: i32) -> (i32, i32) {
    %c0_i32 = arith.constant 0 : i32
    %c0_i32_0 = arith.constant 0 : i32
    %c0_i32_1 = arith.constant 0 : i32
    return %c0_i32, %c0_i32_0 : i32, i32
  }
  func.func @transform_7(%arg0: i32) -> (i32, i32) {
    %c0_i32 = arith.constant 0 : i32
    %c0_i32_0 = arith.constant 0 : i32
    %c0_i32_1 = arith.constant 0 : i32
    return %c0_i32, %c0_i32_0 : i32, i32
  }
  func.func @transform_8(%arg0: i32) -> (i32, i32, i32) {
    %c0_i32 = arith.constant 0 : i32
    %c0_i32_0 = arith.constant 0 : i32
    %c0_i32_1 = arith.constant 0 : i32
    return %arg0, %c0_i32, %c0_i32_0 : i32, i32, i32
  }
}

</mosaic_0001>

<bundles_post_ra>
// kernel: tpu_custom_call.1
= control target key start
LH: loop header
LB: loop body
LE: loop exit
PB: predicated region body
PF: predicated region fallthrough
CT: control target
= control target key end

     0   :  { %13 = vsyncpa [#allocation3], 0  ;;  %s1566_s0 = inlined_call_operand.vmem [shape: f32[2,18,32], index: 0, kind: input, shape index: {}]   ;;  %s1567_s1 = inlined_call_operand.vmem [shape: f32[1,32], index: 1, kind: input, shape index: {}]   ;;  %s1568_s2 = inlined_call_operand.vmem [shape: f32[1,32], index: 2, kind: input, shape index: {}]   ;;  %s1569_s3 = inlined_call_operand.vmem [shape: f32[32,32], index: 3, kind: input, shape index: {}]   ;;  %s1570_s4 = inlined_call_operand.vmem [shape: f32[32,32], index: 4, kind: input, shape index: {}]   ;;  %s1571_s5 = inlined_call_operand.vmem [shape: f32[32,32], index: 5, kind: input, shape index: {}]   ;;  %s1572_s6 = inlined_call_operand.hbm [shape: f32[32,32], index: 6, kind: input, shape index: {}]   ;;  %s1573_s7 = inlined_call_operand.vmem [shape: f32[1,32], index: 7, kind: input, shape index: {}]   ;;  %s1574_s8 = inlined_call_operand.hbm [shape: f32[2,16,32], index: 8, kind: output, shape index: {}]  }
   0x1   :  { %14 = vsyncpa [#allocation4], 0 }
   0x2   :  { %16 = vsyncpa [#allocation4 + $0x1], 0  ;;  %s1304_s27 = smov 0   ;;  %s1306_s28 = smov 0  }
   0x3   :  { %s1308_s29 = smov 0   ;;  %s1310_s30 = smov 0  }
   0x4 LB: > { %s1325_s9 = sadd.s32 4294967295, %s1248_s30   ;;  %s937_s10 = sadd.s32 4294967294, %s1248_s30   ;;  %s1248_s30 = sphi %s1310_s30, %s1590_s30   ;;  %s1244_s29 = sphi %s1308_s29, %s1589_s29   ;;  %s1240_s28 = sphi %s1306_s28, %s1588_s28   ;;  %s1236_s27 = sphi %s1304_s27, %s1587_s27  }
   0x5   : > { %s1329_s11 = sadd.s32 1, %s1248_s30   ;;  %s202_s12 = sadd.s32 1, %s1244_s29 }
   0x6   : > { %s199_s13 = ssub.s32 %s1248_s30, %s1329_s11  ;;  %p212_p0 = scmp.ne.s32.totalorder %s1244_s29, %s1240_s28 }
   0x7   : > { %p200_p1 = scmp.eq.s32.totalorder %s199_s13, 0  ;;  %p213_p2 = scmp.eq.s32.totalorder %s1325_s9, 1 }
   0x8   : > { %p218_p3 = scmp.ne.s32.totalorder %s1240_s28, %s1236_s27  ;;  %p219_p4 = scmp.eq.s32.totalorder %s937_s10, 1 }
   0x9   : > { %s1340_s14 = scalar_select %p200_p1, %s1244_s29, %s202_s12  }
   0xa   : > { %p1342_p5 = por %p213_p2, %p212_p0  ;;  %p1346_p6 = por %p219_p4, %p218_p3 }
   0xb   : > { %p938_p7 = scmp.ge.s32.totalorder %s1248_s30, 1  ;;  %p226_p8 = scmp.lt.s32.totalorder %s1248_s30, 3 }
   0xc   : > { %s1578_s15 = scalar_select %p1342_p5, 1, 0 }
   0xd   : > { %s1579_s16 = scalar_select %p1346_p6, 1, 0 }
   0xe   : > { %p1575_p9 = scmp.eq.s32.totalorder %s1325_s9, 0  ;;  %p1353_p10 = pnand %p938_p7, %p226_p8 }
   0xf   : > { %s1250_s18 = smov [#allocation2]   ;;  %s1154_s23 = scalar_lea.hbm %s1572_s6, 512 }
  0x10   : > { %s1580_s17 = scalar_select %p1353_p10, 1, 0 }
  0x11   : > { %s253_s19 = sshll.u32 %s1250_s18, 4  ;;  %p1085_p11 = pneg %p1353_p10  ;;  %s254_s19 = int_to_ptr.vmem [resolvable:$true] %s253_s19 }
  0x12   : > { %p1155_p13 = scmp.ne.s32.totalorder %s1572_s6, %s1154_s23  ;;  %p1161_p3 = scmp.lt.u32.totalorder %s1154_s23, %s1572_s6 }
  0x13   : > { %p1361_p12 = pnand %p1575_p9, %p1085_p11 }
  0x15   : > { %p1156_p0 = pneg %p1361_p12 }
  0x17   : > { %p1157_p1 = pnand %p1156_p0, %p1155_p13 }
  0x19   : > { %p1158_p2 = pneg %p1157_p1 }
  0x1b   : > { %p1163_p4 = pnand %p1161_p3, %p1158_p2 }
  0x1d   : > { %1166 = shalt.err (!%p1163_p4)
}
  0x1e   : > { %s1167_s12 = scalar_lea.vmem %s254_s19, 512  ;;  %p1175_p9 = scmp.lt.s32.totalorder %s254_s19, %s254_s19 }
  0x1f   : > { %p1168_p7 = scmp.ne.s32.totalorder %s254_s19, %s1167_s12  ;;  %p1176_p6 = scmp.lt.s32.totalorder %s1167_s12, %s1167_s12 }
  0x21   : > { %p1170_p8 = pnand %p1168_p7, %p1156_p0  ;;  %p1177_p5 = por %p1176_p6, %p1175_p9 }
  0x23   : > { %p1171_p11 = pneg %p1170_p8 }
  0x25   : > { %p1178_p10 = pnand %p1177_p5, %p1171_p11 }
  0x27   : > { %1181 = shalt.err (!%p1178_p10)
}
  0x28   : > { %s1251_s13 = smov 128   ;;  %s1252_s18 = smov 8  }
  0x29   : > { %1088 = dma.hbm_to_vmem [thread:$0]  (!%p1361_p12), %s1572_s6, 512, %s254_s19, [#allocation3], %s1251_s13, %s1251_s13, %s1252_s18  }
  0x2a   : > { %p1582_p13 = scmp.ne.s32.totalorder %s1580_s17, 0 }
  0x2b   : > { %p1583_p1 = scmp.eq.s32.totalorder (!%p1582_p13), %s1325_s9, 0 }
  0x2c   : > { %280 = sbr.rel (%p1582_p13) target bundleno = 1218 (0x4c2), region = 52 }
  0x33   : > { %1227 = dma.done.wait (%p1583_p1), [#allocation3], 512   ;;  %p1584_p0 = pmov %p1583_p1 }
  0x34   : > { %p314_p5 = scmp.lt.s32.totalorder %s1325_s9, 1  ;;  %vm322_vm0 = vcmask 261120   ;;  %vm329_vm1 = vcmask 254976   ;;  %v384_v11 = vld [vmem:[%s1570_s4] sm:$0xff]  ;;  %v385_v12 = vld [vmem:[%s1570_s4 + $0x8] sm:$0xff]  ;;  %v1253_v14 = vmov 0.0|0.0   ;;  %v539_v50 = vlaneseq }
  0x35   : > { %1229 = vsyncadd (%p1584_p0), [#allocation3], 4294966784  ;;  %v461_v13 = vld [vmem:[%s1571_s5] sm:$0xff]  ;;  %1054 = vmatprep.subr.bf16.mxu0 %v1253_v14  ;;  %1060 = vmatprep.subr.bf16.mxu1 %v1253_v14  ;;  %v1055_v15 = vpack.c.bf16 %v385_v12, %v384_v11  ;;  %v462_v16 = vld [vmem:[%s1571_s5 + $0x8] sm:$0xff]  ;;  %vm1254_vm2 = vmmov 0   ;;  %v1255_v22 = vmov 0.0  }
  0x36   : > { %s315_s23 = scalar_select %p314_p5, %s1325_s9, 1  ;;  %v386_v17 = vld [vmem:[%s1570_s4 + $0x10] sm:$0xff]  ;;  %v387_v18 = vld [vmem:[%s1570_s4 + $0x18] sm:$0xff]  ;;  %v1061_v19 = vpack.c.bf16 %v462_v16, %v461_v13  ;;  %1001 = vmatprep.mubr.msk.f32.mxu0 %vm1254_vm2, %v1255_v22  ;;  %1012 = vmatprep.mubr.msk.f32.mxu1 %vm1254_vm2, %v1255_v22  ;;  %v1455_v39 = vld [vmem:[%s1567_s1] ss:$0 sm:$0xff]  ;;  %v540_v51 = vshrl.u32 %v539_v50, 7 }
  0x37   : > { %v463_v20 = vld [vmem:[%s1571_s5 + $0x10] sm:$0xff]  ;;  %v464_v21 = vld [vmem:[%s1571_s5 + $0x18] sm:$0xff]  ;;  %1056 = vmatpush3.bf16.msra.mxu0 %v1055_v15  ;;  %v1058_v23 = vpack.c.bf16 %v387_v18, %v386_v17  ;;  %v559_v41 = vld [vmem:[#allocation2] sm:$0xff]  ;;  %vm757_vm3 = vcmask 1040384   ;;  %vm747_vm4 = vcmask 7168   ;;  %s311_s10 = sand.u32 1, %s1240_s28  }
  0x38   : > { %s1078_s24 = smul.u32 24, %s315_s23  ;;  %1062 = vmatpush3.bf16.msra.mxu1 %v1061_v19  ;;  %1057 = vmatprep.subr.bf16.mxu0 %v1253_v14  ;;  %v1064_v24 = vpack.c.bf16 %v464_v21, %v463_v20  ;;  %v560_v42 = vld [vmem:[#allocation2 + $0x8] sm:$0xff]  ;;  %v1460_v43 = vld [vmem:[%s1568_s2] ss:$0 sm:$0xff]  ;;  %v561_v47 = vld [vmem:[#allocation2 + $0x10] sm:$0xff]  ;;  %v541_v52 = vsub.s32 0, %v540_v51 }
  0x39   : > { %1063 = vmatprep.subr.bf16.mxu1 %v1253_v14  ;;  %v1067_v45 = vpack.c.bf16 %v560_v42, %v559_v41  ;;  %v562_v48 = vld [vmem:[#allocation2 + $0x18] sm:$0xff]  ;;  %v536_v55 = vld [vmem:[%s1569_s3 + $0x8] sm:$0xff]  ;;  %v535_v56 = vld [vmem:[%s1569_s3] sm:$0xff]  ;;  %s943_s18 = sshll.u32 %s311_s10, 4  ;;  %vm844_vm5 = vcmask 261121   ;;  %s966_s23 = sshll.u32 %s1325_s9, 8 }
  0x3a   : > { %s318_s26 = scalar_lea.vmem %s1566_s0, %s1078_s24  ;;  %v1070_v49 = vpack.c.bf16 %v562_v48, %v561_v47  ;;  %v538_v60 = vld [vmem:[%s1569_s3 + $0x18] sm:$0xff]  ;;  %v537_v61 = vld [vmem:[%s1569_s3 + $0x10] sm:$0xff]  ;;  %v956_v50 = vld [vmem:[%s1573_s7] ss:$0 sm:$0xff]  ;;  %s313_s21 = scalar_lea.vmem [#allocation5], %s943_s18  ;;  %vm847_vm6 = vcmask 253952  }
  0x3b   : > { %v1392_v0 = vld [vmem:[%s318_s26] sm:$0xff]  ;;  %v1396_v2 = vld [vmem:[%s318_s26 + $0x8] sm:$0xff]  ;;  %v1398_v3 = vld [vmem:[%s318_s26 + $0x10] sm:$0x3]  ;;  %1059 = vmatpush3.bf16.msra.mxu0 %v1058_v23  ;;  %s863_s22 = sshll.u32 %s313_s21, 4  ;;  %s1522_s25 = scalar_lea.hbm %s1574_s8, %s966_s23  ;;  %s1517_s22 = int_to_ptr.vmem [resolvable:$true] %s863_s22 }
  0x3c   : > { %v323_v1 = vsel %vm322_vm0, %v1392_v0, 0.0  ;;  %v326_v4 = vsel %vm322_vm0, %v1396_v2, 0.0  ;;  %v330_v5 = vsel %vm329_vm1, %v1398_v3, 0.0  ;;  %1065 = vmatpush3.bf16.msra.mxu1 %v1064_v24  ;;  %1066 = vmatprep.subr.bf16.mxu0 %v1253_v14  ;;  %s1525_s9 = scalar_lea.sflag [#allocation4], %s311_s10  ;;  %s1182_s26 = scalar_lea.vmem %s1517_s22, 256 }
  0x3d   : > { %324 = vadd.xlane.f32.xlu0 %v323_v1  ;;  %327 = vadd.xlane.f32.xlu1 %v326_v4  ;;  %p1183_p6 = scmp.ne.s32.totalorder %s1517_s22, %s1182_s26  ;;  %p1585_p9 = scmp.ne.s32.totalorder %s1578_s15, 0 }
  0x3e   : > { %1072 = vmatprep.subr.bf16.mxu1 %v1253_v14  ;;  %s1256_s17 = smov [#allocation5]  }
  0x3f   : > { %p1184_p10 = pnand %p1183_p6, %p1585_p9  ;;  %s1186_s19 = sshll.u32 %s1256_s17, 4  ;;  %s1187_s19 = int_to_ptr.vmem [resolvable:$false] %s1186_s19 }
  0x40   : > { %s1188_s12 = scalar_lea.vmem %s1187_s19, 512  ;;  %p1189_p2 = scmp.lt.s32.totalorder %s1517_s22, %s1187_s19 }
  0x41   : > { %331 = vadd.xlane.f32.xlu1 %v330_v5  ;;  %p1185_p12 = pneg %p1184_p10  ;;  %p1190_p3 = scmp.lt.s32.totalorder %s1188_s12, %s1182_s26 }
  0x43   : > { %p1191_p4 = por %p1190_p3, %p1189_p2 }
  0x45   : > { %p1192_p7 = pnand %p1191_p4, %p1185_p12 }
  0xca   : > { %v325_v6 = vpop.xlane.xlu0 %324  ;;  %v328_v25 = vpop.xlane.xlu1 %327 }
  0xcb   : > { %v334_v7 = vmul.f32 0.03125, %v325_v6  ;;  %v335_v26 = vmul.f32 0.03125, %v328_v25 }
  0xcd   : > { %v337_v8 = vsub.f32 %v1392_v0, %v334_v7  ;;  %v1441_v27 = vsub.f32 %v1396_v2, %v335_v26 }
  0xce   : > { %v332_v28 = vpop.xlane.xlu1 %331 }
  0xcf   : > { %v340_v9 = vmul.f32 %v337_v8, %v337_v8  ;;  %v336_v29 = vmul.f32 0.03125, %v332_v28  ;;  %v341_v30 = vmul.f32 %v1441_v27, %v1441_v27 }
  0xd1   : > { %v343_v10 = vsel %vm322_vm0, %v340_v9, 0.0  ;;  %v1446_v31 = vsub.f32 %v1398_v3, %v336_v29  ;;  %v346_v32 = vsel %vm322_vm0, %v341_v30, 0.0 }
  0xd2   : > { %344 = vadd.xlane.f32.xlu0 %v343_v10 }
  0xd3   : > { %v342_v33 = vmul.f32 %v1446_v31, %v1446_v31 }
  0xd5   : > { %v349_v34 = vsel %vm329_vm1, %v342_v33, 0.0 }
  0xd6   : > { %347 = vadd.xlane.f32.xlu0 %v346_v32  ;;  %350 = vadd.xlane.f32.xlu1 %v349_v34 }
 0x15f   : > { %v345_v35 = vpop.xlane.xlu0 %344 }
 0x160   : > { %v352_v36 = vmul.f32 0.03125, %v345_v35 }
 0x162   : > { %v355_v37 = vadd.f32 1e-05, %v352_v36 }
 0x163   : > { %v348_v9 = vpop.xlane.xlu0 %347  ;;  %v351_v11 = vpop.xlane.xlu1 %350 }
 0x164   : > { %1136 = vrsqrt.f32 %v355_v37  ;;  %v353_v10 = vmul.f32 0.03125, %v348_v9  ;;  %v354_v13 = vmul.f32 0.03125, %v351_v11 }
 0x166   : > { %v356_v12 = vadd.f32 1e-05, %v353_v10  ;;  %v357_v15 = vadd.f32 1e-05, %v354_v13 }
 0x168   : > { %1138 = vrsqrt.f32 %v356_v12 }
 0x169   : > { %1140 = vrsqrt.f32 %v357_v15 }
 0x16e   : > { %v1137_v38 = vpop.eup %1136 }
 0x16f   : > { %v361_v40 = vmul.f32 %v1137_v38, %v337_v8 }
 0x171   : > { %v371_v44 = vmul.f32 %v1455_v39, %v361_v40 }
 0x172   : > { %v1139_v18 = vpop.eup %1138 }
 0x173   : > { %v381_v46 = vadd.f32 %v1460_v43, %v371_v44  ;;  %v362_v23 = vmul.f32 %v1139_v18, %v1441_v27  ;;  %v1141_v24 = vpop.eup %1140 }
 0x174   : > { %v363_v28 = vmul.f32 %v1141_v24, %v1446_v31 }
 0x175   : > { %1002 = vmatmul.mubr.msk.f32.vlgmr.msra.gmra.mrb[0].mxu0 %vm322_vm0, %v381_v46  ;;  %1013 = vmatmul.mubr.msk.f32.vlgmr.msra.gmra.mrb[0].mxu1 %vm322_vm0, %v381_v46  ;;  %v372_v26 = vmul.f32 %v1455_v39, %v362_v23 }
 0x176   : > { %1068 = vmatpush3.bf16.msra.mxu0 %v1067_v45  ;;  %1023 = vmatprep.mubr.msk.f32.mxu0 %vm1254_vm2, %v1255_v22  ;;  %v373_v30 = vmul.f32 %v1455_v39, %v363_v28 }
 0x177   : > { %1069 = vmatprep.subr.bf16.mxu0 %v1253_v14  ;;  %1034 = vmatprep.mubr.msk.f32.mxu1 %vm1254_vm2, %v1255_v22  ;;  %v382_v29 = vadd.f32 %v1460_v43, %v372_v26 }
 0x17a   : > { %1071 = vmatpush3.bf16.msra.mxu0 %v1070_v49 }
 0x17b   : > { %1043 = vmatprep.subr.mxu0 %v1255_v22 }
 0x248   : > { %v457_v53 = vpop.f32.mrb[0].mxu0  ;;  %v531_v54 = vpop.f32.mrb[0].mxu1 }
 0x249   : > { %v542_v57 = vrot.slane %v457_v53, %v541_v52  ;;  %v1003_v58 = vpop.f32.mrb[1].mxu0  ;;  %v1014_v59 = vpop.f32.mrb[1].mxu1  ;;  %1024 = vmatmul.mubr.msk.f32.vlgmr.msra.gmra.mrb[2].mxu0 %vm322_vm0, %v531_v54 }
 0x24a   : > { %1045 = vmatprep.mubr.msk.f32.mxu0 %vm1254_vm2, %v1255_v22 }
 0x24b   : > { %v544_v62 = vmul.f32 %v542_v57, %v536_v55  ;;  %v543_v63 = vmul.f32 %v542_v57, %v535_v56  ;;  %v546_v5 = vmul.f32 %v542_v57, %v538_v60  ;;  %v545_v6 = vmul.f32 %v542_v57, %v537_v61 }
 0x24d   : > { %v550_v1 = vsel %vm322_vm0, %v544_v62, 0.0  ;;  %v547_v4 = vsel %vm322_vm0, %v543_v63, 0.0  ;;  %v556_v7 = vsel %vm322_vm0, %v546_v5, 0.0  ;;  %v553_v8 = vsel %vm322_vm0, %v545_v6, 0.0 }
 0x24e   : > { %551 = vadd.xlane.f32.xlu1 %v550_v1  ;;  %548 = vadd.xlane.f32.xlu0 %v547_v4 }
 0x252   : > { %557 = vadd.xlane.f32.xlu1 %v556_v7  ;;  %554 = vadd.xlane.f32.xlu0 %v553_v8 }
 0x2db   : > { %v552_v16 = vpop.xlane.xlu1 %551  ;;  %v549_v17 = vpop.xlane.xlu0 %548 }
 0x2dc   : > { %v1073_v19 = vpack.c.bf16 %v552_v16, %v549_v17 }
 0x2de   : > { %1074 = vmatpush3.bf16.msra.mxu1 %v1073_v19 }
 0x2df   : > { %v558_v20 = vpop.xlane.xlu1 %557  ;;  %v555_v21 = vpop.xlane.xlu0 %554  ;;  %1075 = vmatprep.subr.bf16.mxu1 %v1253_v14  ;;  %v383_v14 = vadd.f32 %v1460_v43, %v373_v30 }
 0x2e0   : > { %v1076_v25 = vpack.c.bf16 %v558_v20, %v555_v21 }
 0x2e2   : > { %1077 = vmatpush3.bf16.msra.mxu1 %v1076_v25 }
 0x2e5   : > { %1035 = vmatmul.mubr.msk.f32.vlgmr.msra.gmra.mrb[2].mxu1 %vm322_vm0, %v381_v46 }
 0x2e6   : > { %1037 = vmatprep.mubr.msk.f32.mxu1 %vm1254_vm2, %v1255_v22 }
 0x2e9   : > { %1038 = vmatmul.mubr.msk.f32.gmra.mrb[4].mxu1 %vm322_vm0, %v382_v29 }
 0x2ea   : > { %1040 = vmatprep.mubr.msk.f32.mxu1 %vm1254_vm2, %v1255_v22 }
 0x2ed   : > { %1041 = vmatmul.mubr.msk.f32.gmra.mrb[6].mxu1 %vm322_vm0, %v383_v14 }
 0x31c   : > { %v632_v27 = vpop.f32.mrb[2].mxu0 }
 0x31d   : > { %v1025_v31 = vpop.f32.mrb[3].mxu0  ;;  %1044 = vmatpush3.msk.msra.mxu0 %vm757_vm3, %v632_v27 }
 0x3b8   : > { %v708_v32 = vpop.f32.mrb[2].mxu1 }
 0x3b9   : > { %v953_v33 = vmul.f32 -1.442695, %v708_v32  ;;  %v1036_v34 = vpop.f32.mrb[3].mxu1 }
 0x3bb   : > { %1142 = vpow2.f32 %v953_v33 }
 0x3bc   : > { %v713_v35 = vpop.f32.mrb[4].mxu1 }
 0x3bd   : > { %v954_v36 = vmul.f32 -1.442695, %v713_v35  ;;  %v1039_v37 = vpop.f32.mrb[5].mxu1 }
 0x3bf   : > { %1144 = vpow2.f32 %v954_v36 }
 0x3c0   : > { %v718_v38 = vpop.f32.mrb[6].mxu1 }
 0x3c1   : > { %v955_v39 = vmul.f32 -1.442695, %v718_v38  ;;  %v1042_v40 = vpop.f32.mrb[7].mxu1 }
 0x3c3   : > { %1146 = vpow2.f32 %v955_v39 }
 0x3c5   : > { %v1143_v41 = vpop.eup %1142 }
 0x3c6   : > { %v731_v42 = vadd.f32 1.0, %v1143_v41 }
 0x3c8   : > { %1148 = vrcp.f32 %v731_v42 }
 0x3c9   : > { %v1145_v43 = vpop.eup %1144 }
 0x3ca   : > { %v732_v44 = vadd.f32 1.0, %v1145_v43 }
 0x3cc   : > { %1150 = vrcp.f32 %v732_v44 }
 0x3cd   : > { %v1147_v45 = vpop.eup %1146 }
 0x3ce   : > { %v733_v46 = vadd.f32 1.0, %v1147_v45 }
 0x3d0   : > { %1152 = vrcp.f32 %v733_v46 }
 0x3d2   : > { %v1149_v47 = vpop.eup %1148 }
 0x3d3   : > { %1046 = vmatmul.mubr.msk.f32.vlgmr.msra.gmra.mrb[4].mxu0 %vm747_vm4, %v1149_v47 }
 0x3d4   : > { %1048 = vmatprep.mubr.msk.f32.mxu0 %vm1254_vm2, %v1255_v22 }
 0x3d6   : > { %v1151_v48 = vpop.eup %1150 }
 0x3d7   : > { %1049 = vmatmul.mubr.msk.f32.gmra.mrb[6].mxu0 %vm747_vm4, %v1151_v48 }
 0x3d8   : > { %1051 = vmatprep.mubr.msk.f32.mxu0 %vm1254_vm2, %v1255_v22 }
 0x3da   : > { %v1153_v49 = vpop.eup %1152 }
 0x3db   : > { %1052 = vmatmul.mubr.msk.f32.gmra.mrb[8].mxu0 %vm747_vm4, %v1153_v49 }
 0x4a6   : > { %v827_v51 = vpop.f32.mrb[4].mxu0 }
 0x4a7   : > { %v828_v52 = vadd.f32 %v956_v50, %v827_v51  ;;  %v1047_v53 = vpop.f32.mrb[5].mxu0 }
 0x4a9   : > { %v841_v54 = vadd.f32 %v828_v52, %v1392_v0 }
 0x4aa   : > { %v832_v55 = vpop.f32.mrb[6].mxu0 }
 0x4ab   : > { %845 = vst.msk [vmem:[%s313_s21 - $0x1] sm:$0xfe] %vm844_vm5, %v841_v54  ;;  %v833_v56 = vadd.f32 %v956_v50, %v832_v55  ;;  %v1050_v22 = vpop.f32.mrb[7].mxu0 }
 0x4ad   : > { %v842_v57 = vadd.f32 %v833_v56, %v1396_v2 }
 0x4ae   : > { %v837_v58 = vpop.f32.mrb[8].mxu0 }
 0x4af   : > { %846 = vst.msk [vmem:[%s313_s21 + $0x7] sm:$0xff] %vm322_vm0, %v842_v57  ;;  %v838_v59 = vadd.f32 %v956_v50, %v837_v58  ;;  %v1053_v60 = vpop.f32.mrb[9].mxu0 }
 0x4b1   : > { %v843_v0 = vadd.f32 %v838_v59, %v1398_v3 }
 0x4b3   : > { %848 = vst.msk [vmem:[%s313_s21 + $0xf] sm:$0x1] %vm847_vm6, %v843_v0 }
 0x4b4   : > { %1195 = shalt.err (!%p1192_p7)
}
 0x4b5   : > { %s1196_s10 = scalar_lea.hbm %s1522_s25, 256  ;;  %s1200_s21 = scalar_lea.hbm %s1574_s8, 512 }
 0x4b6   : > { %p1197_p8 = scmp.ne.s32.totalorder %s1522_s25, %s1196_s10  ;;  %p1201_p1 = scmp.lt.u32.totalorder %s1522_s25, %s1574_s8 }
 0x4b7   : > { %p1202_p0 = scmp.lt.u32.totalorder %s1200_s21, %s1196_s10  ;;  %p1204_p6 = scmp.lt.u32.totalorder %s1196_s10, %s1522_s25 }
 0x4b8   : > { %p1198_p11 = pnand %p1197_p8, %p1585_p9 }
 0x4b9   : > { %p1203_p5 = por %p1202_p0, %p1201_p1 }
 0x4ba   : > { %p1199_p13 = pneg %p1198_p11 }
 0x4bb   : > { %p1205_p10 = por %p1204_p6, %p1203_p5 }
 0x4bd   : > { %p1206_p12 = pnand %p1205_p10, %p1199_p13 }
 0x4bf   : > { %1209 = shalt.err (!%p1206_p12)
}
 0x4c0   : > { %s1257_s20 = smov 128   ;;  %s1258_s26 = smov 8  }
 0x4c1   : > { %1083 = dma.vmem_to_hbm [thread:$0]  (%p1585_p9), %s1517_s22, 256, %s1522_s25, %s1525_s9, %s1257_s20, %s1257_s20, %s1258_s26  }
 0x4c2 PF: > { %p1095_p2 = scmp.ge.s32.totalorder %s1248_s30, 2  ;;  %s878_s17 = sand.u32 1, %s1236_s27  }
 0x4c3   : > { %p1586_p3 = scmp.ne.s32.totalorder %s1579_s16, 0  ;;  %s879_s19 = scalar_lea.sflag [#allocation4], %s878_s17 }
 0x4c5   : > { %p1090_p4 = pnand %p1095_p2, %p1586_p3 }
 0x4c7   : > { %1231 = dma.done.wait (!%p1090_p4), %s879_s19, 256  }
 0x4c8   : > { %1233 = vsyncadd (!%p1090_p4), %s879_s19, 4294967040  ;;  %p19_p7 = scmp.ge.s32.totalorder %s1329_s11, 4   ;;  %s1587_s27 = smov %s1240_s28 }
 0x4c9   : > { %s1588_s28 = smov %s1244_s29  ;;  %s1589_s29 = smov %s1340_s14 }
 0x4ca   : > { %s1590_s30 = smov %s1329_s11  ;;  %21 = sbr.rel (!%p19_p7) target bundleno = 4 (0x4), region = 92 }
 0x4d1   :  { %884 = vsyncpa [#allocation3], 1 }
 0x4d2   :  { %886 = vsyncpa [#allocation3 + $0x1], 1 }
 0x4d3   :  { %887 = vsyncpa [#allocation4], 1 }
 0x4d4   :  { %889 = vsyncpa [#allocation4 + $0x1], 1 }

</bundles_post_ra>
